<compile_context>
chip_gen: v7x
topology: tpu7x:2x2x1
jax: 0.10.0
libtpu: 0.0.40
codegen_flags: <defaults>
</compile_context>

<pallas_src>
import functools
import math

import numpy as np

import jax
import jax.numpy as jnp
from jax.experimental import pallas as pl
from jax.experimental.pallas import tpu as pltpu


# ---------------------------------------------------------------------------
# PE table: built only for the rows actually needed, cached per configuration.
# (lru_cache pins one small device array per (E, S, dtype) tuple.)
# ---------------------------------------------------------------------------
@functools.lru_cache(maxsize=16)
def _pe_table(emb_size: int, seq_len: int, dtype_name: str) -> jnp.ndarray:
    if emb_size % 2 != 0:
        raise ValueError("emb_size must be even for sinusoidal positional encoding")
    position = jnp.arange(seq_len, dtype=jnp.float32)[:, None]              # (S, 1)
    div_term = jnp.exp(
        jnp.arange(0, emb_size, 2, dtype=jnp.float32)
        * (-math.log(10000.0) / emb_size)
    )                                                                        # (E/2,)
    angles = position * div_term                                             # (S, E/2)
    pe = jnp.zeros((seq_len, emb_size), dtype=jnp.float32)
    pe = pe.at[:, 0::2].set(jnp.sin(angles))
    pe = pe.at[:, 1::2].set(jnp.cos(angles))
    # NOTE: PyTorch keeps pe in fp32 and promotes; identical for f32 inputs.
    return pe.astype(jnp.dtype(dtype_name))                                  # (S, E)


# ---------------------------------------------------------------------------
# Kernels
# ---------------------------------------------------------------------------
def _eval_kernel(x_ref, pe_ref, o_ref):
    # x_ref block: (1, tS, Ef); pe_ref block: (tS, Ef). Compute in x.dtype.
    o_ref[...] = (x_ref[...] + pe_ref[...][None, :, :]).astype(o_ref.dtype)


# Hash constants as numpy scalars: literalable in the kernel jaxpr (closing
# over jnp scalars would be rejected as captured constants).
_GOLDEN = np.uint32(0x9E3779B9)
_MIX1 = np.uint32(0x7FEB352D)
_MIX2 = np.uint32(0x846CA68B)


def _make_dropout_kernel(dropout_rate: float, seq_rows: int, tile_rows: int,
                         folded_emb: int):
    scale = 1.0 / (1.0 - dropout_rate)                       # weak Python float
    thresh = np.uint32(min(int(dropout_rate * 4294967296.0), 4294967295))

    def kernel(seed_ref, x_ref, pe_ref, o_ref):
        y = x_ref[...] + pe_ref[...][None, :, :]
        # Counter-based dropout: hash(global element id ^ scrambled seed).
        # Pure VPU integer ops, fully hidden under the HBM DMA.
        # TODO(synk): mask stream is not bit-compatible with torch.nn.Dropout's
        # RNG (statistically equivalent Bernoulli(1-p), p quantized to 2^-32).
        s = pl.program_id(0)
        b = pl.program_id(1)
        row = jax.lax.broadcasted_iota(jnp.int32, y.shape, 1)
        col = jax.lax.broadcasted_iota(jnp.int32, y.shape, 2)
        base = (b * seq_rows + s * tile_rows) * folded_emb            # scalar
        idx = base + row * folded_emb + col                           # unique id
        seed_u = seed_ref[0].astype(jnp.uint32)
        h = idx.astype(jnp.uint32) ^ (seed_u * _GOLDEN)
        # lowbias32 finalizer (Wellons) - good avalanche on counter inputs.
        h = h ^ (h >> 16)
        h = h * _MIX1
        h = h ^ (h >> 15)
        h = h * _MIX2
        h = h ^ (h >> 16)
        keep = h >= thresh                        # P(keep) = 1 - p
        o_ref[...] = jnp.where(keep, y * scale, 0.0).astype(o_ref.dtype)

    return kernel


# ---------------------------------------------------------------------------
# Tiling helpers
# ---------------------------------------------------------------------------
def _lane_fold_factor(seq_len: int, emb: int, target_lanes: int = 2048) -> int:
    """Fold k sequence rows into the lane dim (last dim becomes k*emb).

    Exact row-major regrouping (requires seq_len % k == 0).  Targets a wide,
    128-lane-aligned last dim for unmasked stores and long DMA descriptors,
    folding even when emb is already a multiple of 128.
    """
    best_k = 1
    best_lanes = emb if emb % 128 == 0 else 0
    for k in range(1, seq_len + 1):
        lanes = k * emb
        if lanes > target_lanes:
            break
        if seq_len % k != 0:
            continue
        if lanes % 128 == 0 and lanes > best_lanes:
            best_k, best_lanes = k, lanes
    return best_k


def _vmem_capacity_bytes() -> int:
    try:
        return int(pltpu.get_tpu_info().vmem_capacity_bytes)
    except Exception:
        return 128 * 1024 * 1024      # v5e/v6e-like fallback (e.g. interpret mode)


def _plan_tiling(seq_rows: int, folded_emb: int, itemsize: int, batch: int,
                 with_dropout: bool):
    """Pick the folded-sequence tile and an explicit VMEM limit.

    Byte-based: the x block targets 2-8 MiB so per-grid-step overhead is
    negligible, while the double-buffered x/out/pe blocks plus in-kernel
    temporaries stay inside a generation-aware VMEM budget.
    """
    sublane = max(8, 32 // itemsize)                 # 8 f32 / 16 bf16 / 32 int8
    vmem_cap = _vmem_capacity_bytes()
    # 24 MiB on v7x (64 MiB physical per TC), 48 MiB on v5e/v6e (128 MiB).
    total_budget = min(vmem_cap * 3 // 8, 48 * 1024 * 1024)
    # Per folded row: 2x x + 2x out + 2x pe blocks, plus temporaries margin
    # (the dropout mask path materializes u32 intermediates).
    per_row = folded_emb * itemsize * 6 + folded_emb * 4 * (4 if with_dropout else 1)
    tile = max(sublane, total_budget // per_row)
    # Byte-based x-block cap (~8 MiB), not a row cap.
    tile = min(tile, max(sublane, (8 * 1024 * 1024) // (folded_emb * itemsize)))
    # v7x megacore: with B == 1 make sure the grid still has >= 2 steps.
    if batch == 1 and seq_rows >= 2 * sublane:
        tile = min(tile, max(sublane, (seq_rows // 2) // sublane * sublane))
    tile = max(sublane, (tile // sublane) * sublane)
    if seq_rows <= tile:
        tile = seq_rows                              # full-extent block is legal
    else:
        # Prefer a tile dividing the row count exactly (no masked partial last
        # block), without shrinking below half the byte-derived tile.
        for cand in range(tile, max(sublane, tile // 2) - 1, -sublane):
            if seq_rows % cand == 0:
                tile = cand
                break
    est = per_row * tile + 2 * 1024 * 1024
    vmem_limit = int(min(max(2 * est, 32 * 1024 * 1024), vmem_cap // 2))
    return tile, vmem_limit


# ---------------------------------------------------------------------------
# Public forward
# ---------------------------------------------------------------------------
def positional_encoding_forward(
    x: jnp.ndarray,
    *,
    emb_size: int,
    dropout: float = 0.1,
    max_len: int = 5000,
    training: bool = False,
    seed: int = 0,
) -> jnp.ndarray:
    """Equivalent of PositionalEncoding.forward for x of shape [B, S, E]."""
    if x.ndim != 3:
        raise ValueError("positional encoding expects 3D input")
    B, S, E = x.shape
    if E != emb_size:
        raise ValueError(f"last dim {E} != emb_size {emb_size}")
    if S > max_len:
        raise ValueError(f"sequence length {S} exceeds max_len {max_len}")
    if emb_size % 2 != 0:
        raise ValueError("emb_size must be even")

    use_dropout = training and dropout > 0.0
    if use_dropout and dropout >= 1.0:
        raise ValueError("dropout rate must be < 1.0")

    dtype = jnp.dtype(x.dtype)
    itemsize = dtype.itemsize
    pe = _pe_table(emb_size, S, dtype.name)                       # (S, E) in x.dtype

    # Lane-dense fold (exact row-major reshape of both x and pe).
    k = _lane_fold_factor(S, E)
    Sf, Ef = S // k, E * k
    xf = x.reshape(B, Sf, Ef)
    pef = pe.reshape(Sf, Ef)

    tS, vmem_limit = _plan_tiling(Sf, Ef, itemsize, B, use_dropout)
    grid = (pl.cdiv(Sf, tS), B)     # S-tile OUTER, batch INNER → pe DMA reused

    out_shape = jax.ShapeDtypeStruct((B, Sf, Ef), x.dtype)
    cost = pl.CostEstimate(
        flops=B * S * E,
        transcendentals=0,
        bytes_accessed=(2 * B * S * E + S * E) * itemsize,
    )
    cparams = pltpu.CompilerParams(
        dimension_semantics=("parallel", "parallel"),
        vmem_limit_bytes=vmem_limit,
    )

    if use_dropout:
        kernel = _make_dropout_kernel(float(dropout), Sf, tS, Ef)
        seed_arr = jnp.asarray([seed], dtype=jnp.int32)
        grid_spec = pltpu.PrefetchScalarGridSpec(
            num_scalar_prefetch=1,
            grid=grid,
            in_specs=[
                pl.BlockSpec((1, tS, Ef), lambda s, b, seed_ref: (b, s, 0)),  # x
                pl.BlockSpec((tS, Ef), lambda s, b, seed_ref: (s, 0)),        # pe
            ],
            out_specs=pl.BlockSpec((1, tS, Ef), lambda s, b, seed_ref: (b, s, 0)),
        )
        out = pl.pallas_call(
            kernel,
            out_shape=out_shape,
            grid_spec=grid_spec,
            compiler_params=cparams,
            cost_estimate=cost,
        )(seed_arr, xf, pef)
    else:
        grid_spec = pl.GridSpec(
            grid=grid,
            in_specs=[
                pl.BlockSpec((1, tS, Ef), lambda s, b: (b, s, 0)),            # x
                pl.BlockSpec((tS, Ef), lambda s, b: (s, 0)),                  # pe
            ],
            out_specs=pl.BlockSpec((1, tS, Ef), lambda s, b: (b, s, 0)),
        )
        out = pl.pallas_call(
            _eval_kernel,
            out_shape=out_shape,
            grid_spec=grid_spec,
            compiler_params=cparams,
            cost_estimate=cost,
        )(xf, pef)

    return out.reshape(B, S, E)


# ---------------------------------------------------------------------------
# Self-test
# ---------------------------------------------------------------------------
if __name__ == "__main__":
    B, S, E = 2, 8, 32
    key = jax.random.PRNGKey(0)
    x = jax.random.normal(key, (B, S, E), dtype=jnp.float32)

    # Eval-mode forward (dropout = identity), matching module.eval() semantics.
    out = positional_encoding_forward(
        x, emb_size=E, dropout=0.1, max_len=5000, training=False
    )
    out = jax.block_until_ready(out)

    # Pure-JAX reference: x + pe[:S][None, :, :]
    ref = x + _pe_table(E, S, "float32")[None, :, :]
    assert out.shape == (B, S, E)
    assert jnp.allclose(out, ref, atol=1e-5, rtol=1e-5)

    # Training-mode forward: dropped entries are zero, kept entries are scaled
    # by 1/(1-p); keep fraction is roughly 1-p.
    p = 0.5
    out_tr = positional_encoding_forward(
        x, emb_size=E, dropout=p, max_len=5000, training=True, seed=42
    )
    out_tr = jax.block_until_ready(out_tr)
    assert out_tr.shape == (B, S, E)
    kept = out_tr != 0.0
    expected_kept = ref / (1.0 - p)
    assert jnp.allclose(
        jnp.where(kept, out_tr, 0.0),
        jnp.where(kept, expected_kept, 0.0),
        atol=1e-4,
        rtol=1e-4,
    )
    keep_frac = float(jnp.mean(kept.astype(jnp.float32)))
    assert 0.2 < keep_frac < 0.8

    print("KERNEL_OK")
</pallas_src>

<mosaic_0001>
module attributes {stable_mosaic.version = 11 : i64} {
  func.func @_eval_kernel(%arg0: i32, %arg1: i32, %arg2: memref<1x1x256xf32, #tpu.memory_space<vmem>>, %arg3: memref<1x256xf32, #tpu.memory_space<vmem>>, %arg4: memref<1x1x256xf32, #tpu.memory_space<vmem>>) attributes {dimension_semantics = [#tpu.dimension_semantics<parallel>, #tpu.dimension_semantics<parallel>], iteration_bounds = array<i64: 1, 2>, scalar_prefetch = 0 : i64, scratch_operands = 0 : i64, tpu.core_type = #tpu.core_type<tc>, window_params = [{transform_indices = @transform_0, window_bounds = array<i64: 1, 1, 256>}, {transform_indices = @transform_1, window_bounds = array<i64: 1, 256>}, {transform_indices = @transform_2, window_bounds = array<i64: 1, 1, 256>}]} {
    %c0 = arith.constant 0 : index
    %c0_0 = arith.constant 0 : index
    %c0_1 = arith.constant 0 : index
    %0 = vector.load %arg2[%c0, %c0_0, %c0_1] : memref<1x1x256xf32, #tpu.memory_space<vmem>>, vector<1x1x256xf32>
    %c0_2 = arith.constant 0 : index
    %c0_3 = arith.constant 0 : index
    %1 = vector.load %arg3[%c0_2, %c0_3] : memref<1x256xf32, #tpu.memory_space<vmem>>, vector<1x256xf32>
    %2 = vector.shape_cast %1 : vector<1x256xf32> to vector<1x1x256xf32>
    %3 = arith.addf %0, %2 : vector<1x1x256xf32>
    %c0_4 = arith.constant 0 : index
    %c0_5 = arith.constant 0 : index
    %c0_6 = arith.constant 0 : index
    %4 = vector.load %arg4[%c0_4, %c0_5, %c0_6] : memref<1x1x256xf32, #tpu.memory_space<vmem>>, vector<1x1x256xf32>
    tpu.vector_store %arg4[%c0_4, %c0_5, %c0_6], %3 {strides = array<i32>} : memref<1x1x256xf32, #tpu.memory_space<vmem>>, vector<1x1x256xf32>,
    return
  }
  func.func @transform_0(%arg0: i32, %arg1: i32) -> (i32, i32, i32) {
    %c0_i32 = arith.constant 0 : i32
    %c0_i32_0 = arith.constant 0 : i32
    return %arg1, %arg0, %c0_i32 : i32, i32, i32
  }
  func.func @transform_1(%arg0: i32, %arg1: i32) -> (i32, i32) {
    %c0_i32 = arith.constant 0 : i32
    %c0_i32_0 = arith.constant 0 : i32
    return %arg0, %c0_i32 : i32, i32
  }
  func.func @transform_2(%arg0: i32, %arg1: i32) -> (i32, i32, i32) {
    %c0_i32 = arith.constant 0 : i32
    %c0_i32_0 = arith.constant 0 : i32
    return %arg1, %arg0, %c0_i32 : i32, i32, i32
  }
}

</mosaic_0001>

<bundles_post_ra>
// kernel: tpu_custom_call.1
= control target key start
LH: loop header
LB: loop body
LE: loop exit
PB: predicated region body
PF: predicated region fallthrough
CT: control target
= control target key end

     0   :  { %7 = vsyncpa [#allocation3], 0  ;;  %s705_s0 = inlined_call_operand.hbm [shape: f32[2,1,256], index: 0, kind: input, shape index: {}]   ;;  %s706_s1 = inlined_call_operand.vmem [shape: f32[1,256], index: 1, kind: input, shape index: {}]   ;;  %s707_s2 = inlined_call_operand.hbm [shape: f32[2,1,256], index: 2, kind: output, shape index: {}]  }
   0x1   :  { %9 = vsyncpa [#allocation3 + $0x1], 0 }
   0x2   :  { %10 = vsyncpa [#allocation4], 0 }
   0x3   :  { %12 = vsyncpa [#allocation4 + $0x1], 0  ;;  %s530_s9 = smov 0   ;;  %s532_s10 = smov 0  }
   0x4   :  { %s534_s11 = smov 0   ;;  %s536_s12 = smov 0  }
   0x5   :  { %s538_s13 = smov 0   ;;  %s540_s14 = smov 0  }
   0x6 LB: > { %s319_s15 = sadd.s32 4294967295, %s511_s14   ;;  %s320_s16 = sadd.s32 4294967294, %s511_s14   ;;  %s511_s14 = sphi %s540_s14, %s18_s14   ;;  %s507_s13 = sphi %s538_s13, %s723_s13   ;;  %s503_s12 = sphi %s536_s12, %s722_s12   ;;  %s499_s11 = sphi %s534_s11, %s721_s11   ;;  %s495_s10 = sphi %s532_s10, %s720_s10   ;;  %s491_s9 = sphi %s530_s9, %s719_s9  }
   0x7   : > { %s27_s17 = sadd.s32 1, %s507_s13  ;;  %s39_s18 = sadd.s32 1, %s499_s11 }
   0x8   : > { %p28_p0 = scmp.ge.s32.totalorder %s27_s17, 2  ;;  %p46_p1 = scmp.ne.s32.totalorder %s499_s11, %s495_s10 }
   0x9   : > { %p47_p2 = scmp.eq.s32.totalorder %s511_s14, 0  ;;  %p52_p3 = scmp.ne.s32.totalorder %s495_s10, %s491_s9 }
   0xa   : > { %s725_s17 = smov (%p28_p0, %s27_s17), 0  ;;  %p53_p5 = scmp.eq.s32.totalorder %s319_s15, 0 }
   0xb   : > { %p571_p4 = por %p47_p2, %p46_p1  ;;  %s34_s20 = ssub.s32 %s507_s13, %s725_s17 }
   0xc   : > { %p104_p6 = scmp.eq.s32.totalorder %s319_s15, 1  ;;  %p37_p7 = scmp.eq.s32.totalorder %s34_s20, 0 }
   0xd   : > { %p577_p8 = por %p53_p5, %p52_p3  ;;  %p110_p10 = scmp.eq.s32.totalorder %s320_s16, 1 }
   0xe   : > { %p581_p9 = por %p104_p6, %p46_p1  ;;  %p349_p13 = scmp.lt.s32.totalorder %s511_s14, 2 }
   0xf   : > { %s586_s23 = scalar_select %p37_p7, %s499_s11, %s39_s18  }
  0x10   : > { %s711_s22 = scalar_select %p581_p9, 1, 0 }
  0x11   : > { %p588_p11 = por %p110_p10, %p52_p3  ;;  %s137_s25 = sand.u32 1, %s499_s11  }
  0x12   : > { %s324_s26 = sshll.u32 %s137_s25, 1  ;;  %s335_s27 = sshll.u32 %s507_s13, 5 }
  0x13   : > { %s712_s24 = scalar_select %p588_p11, 1, 0 }
  0x14   : > { %s599_s30 = scalar_lea.hbm %s705_s0, %s335_s27  ;;  %s141_s3 = scalar_lea.vmem [#allocation2], %s324_s26 }
  0x15   : > { %s151_s4 = sshll.u32 %s141_s3, 4  ;;  %p605_p0 = pnand %p349_p13, %p571_p4  ;;  %s601_s4 = int_to_ptr.vmem [resolvable:$true] %s151_s4 }
  0x16   : > { %s138_s6 = scalar_lea.sflag [#allocation3], %s137_s25  ;;  %s399_s7 = scalar_lea.hbm %s599_s30, 32 }
  0x17   : > { %p400_p3 = scmp.ne.s32.totalorder %s599_s30, %s399_s7  ;;  %p401_p5 = pneg %p605_p0 }
  0x18   : > { %s404_s16 = scalar_lea.hbm %s705_s0, 64  ;;  %p405_p4 = scmp.lt.u32.totalorder %s599_s30, %s705_s0 }
  0x19   : > { %p402_p6 = pnand %p401_p5, %p400_p3  ;;  %p406_p10 = scmp.lt.u32.totalorder %s404_s16, %s399_s7 }
  0x1a   : > { %p408_p12 = scmp.lt.u32.totalorder %s399_s7, %s599_s30 }
  0x1b   : > { %p403_p7 = pneg %p402_p6  ;;  %p407_p13 = por %p406_p10, %p405_p4 }
  0x1d   : > { %p409_p1 = por %p408_p12, %p407_p13 }
  0x1f   : > { %p410_p2 = pnand %p409_p1, %p403_p7 }
  0x21   : > { %413 = shalt.err (!%p410_p2)
}
  0x22   : > { %s414_s20 = scalar_lea.vmem %s601_s4, 32  ;;  %s513_s25 = smov [#allocation2]  }
  0x23   : > { %p415_p3 = scmp.ne.s32.totalorder %s601_s4, %s414_s20  ;;  %s419_s26 = sshll.u32 %s513_s25, 4  ;;  %s420_s26 = int_to_ptr.vmem [resolvable:$false] %s419_s26 }
  0x24   : > { %s421_s27 = scalar_lea.vmem %s420_s26, 64  ;;  %p422_p9 = scmp.lt.s32.totalorder %s601_s4, %s420_s26 }
  0x25   : > { %p417_p6 = pnand %p415_p3, %p401_p5  ;;  %p423_p4 = scmp.lt.s32.totalorder %s421_s27, %s414_s20 }
  0x27   : > { %p418_p11 = pneg %p417_p6  ;;  %p424_p10 = por %p423_p4, %p422_p9 }
  0x29   : > { %p425_p12 = pnand %p424_p10, %p418_p11 }
  0x2b   : > { %428 = shalt.err (!%p425_p12)
}
  0x2c   : > { %344 = dma.hbm_to_vmem [thread:$0]  (!%p605_p0), %s599_s30, 32, %s601_s4, %s138_s6  }
  0x2d   : > { %p714_p1 = scmp.lt.s32.totalorder %s511_s14, 3  ;;  %p715_p2 = scmp.ge.s32.totalorder %s511_s14, 1 }
  0x2f   : > { %p157_p5 = pnand %p715_p2, %p714_p1 }
  0x30   : > { %s641_s28 = sand.u32 (!%p157_p5), 1, %s495_s10  }
  0x31   : > { %160 = sbr.rel (%p157_p5) target bundleno = 83 (0x53), region = 28  ;;  %s328_s29 = sshll.u32 (!%p157_p5), %s641_s28, 1 }
  0x32   : > { %s163_s3 = scalar_lea.sflag (!%p157_p5), [#allocation3], %s641_s28  ;;  %s166_s7 = scalar_lea.vmem (!%p157_p5), [#allocation2], %s328_s29 }
  0x38   : > { %482 = dma.done.wait (%p577_p8), %s163_s3, 32  }
  0x39   : > { %484 = vsyncadd (%p577_p8), %s163_s3, 4294967264  ;;  %v198_v0 = vlaneseq  ;;  %s190_s30 = scalar_lea.vmem [#allocation5], %s328_s29  ;;  %s336_s5 = sshll.u32 %s503_s12, 5  ;;  %v195_v1 = vld [vmem:[%s166_s7] sm:$0x3] }
  0x3a   : > { %s220_s4 = sshll.u32 %s190_s30, 4  ;;  %v196_v2 = vld [vmem:[%s706_s1] sm:$0x3]  ;;  %s658_s21 = scalar_lea.hbm %s707_s2, %s336_s5  ;;  %s653_s4 = int_to_ptr.vmem [resolvable:$true] %s220_s4 }
  0x3b   : > { %vm200_vm0 = vcmp.lt.s32.totalorder %v198_v0, 256  ;;  %v197_v3 = vadd.f32 %v196_v2, %v195_v1  ;;  %s204_s18 = scalar_lea.sflag [#allocation4], %s641_s28  ;;  %s429_s12 = scalar_lea.vmem %s653_s4, 32 }
  0x3c   : > { %p430_p8 = scmp.ne.s32.totalorder %s653_s4, %s429_s12  ;;  %p716_p9 = scmp.ne.s32.totalorder %s711_s22, 0 }
  0x3d   : > { %202 = vst.msk [vmem:[%s190_s30] sm:$0x3] %vm200_vm0, %v197_v3  ;;  %s514_s19 = smov [#allocation5]  }
  0x3e   : > { %p431_p11 = pnand %p430_p8, %p716_p9  ;;  %s433_s20 = sshll.u32 %s514_s19, 4  ;;  %s434_s20 = int_to_ptr.vmem [resolvable:$false] %s433_s20 }
  0x3f   : > { %s435_s25 = scalar_lea.vmem %s434_s20, 64  ;;  %p436_p7 = scmp.lt.s32.totalorder %s653_s4, %s434_s20 }
  0x40   : > { %p432_p0 = pneg %p431_p11  ;;  %p437_p13 = scmp.lt.s32.totalorder %s435_s25, %s429_s12 }
  0x42   : > { %p438_p3 = por %p437_p13, %p436_p7 }
  0x44   : > { %p439_p6 = pnand %p438_p3, %p432_p0 }
  0x46   : > { %442 = shalt.err (!%p439_p6)
}
  0x47   : > { %s443_s26 = scalar_lea.hbm %s658_s21, 32  ;;  %s447_s29 = scalar_lea.hbm %s707_s2, 64 }
  0x48   : > { %p444_p4 = scmp.ne.s32.totalorder %s658_s21, %s443_s26  ;;  %p448_p1 = scmp.lt.u32.totalorder %s658_s21, %s707_s2 }
  0x49   : > { %p449_p2 = scmp.lt.u32.totalorder %s447_s29, %s443_s26  ;;  %p451_p8 = scmp.lt.u32.totalorder %s443_s26, %s658_s21 }
  0x4a   : > { %p445_p10 = pnand %p444_p4, %p716_p9 }
  0x4b   : > { %p450_p5 = por %p449_p2, %p448_p1 }
  0x4c   : > { %p446_p12 = pneg %p445_p10 }
  0x4d   : > { %p452_p11 = por %p451_p8, %p450_p5 }
  0x4f   : > { %p453_p0 = pnand %p452_p11, %p446_p12 }
  0x51   : > { %456 = shalt.err (!%p453_p0)
}
  0x52   : > { %339 = dma.vmem_to_hbm [thread:$0]  (%p716_p9), %s653_s4, 32, %s658_s21, %s204_s18  }
  0x53 PF: > { %s232_s30 = sand.u32 1, %s491_s9   ;;  %p717_p7 = scmp.ne.s32.totalorder %s712_s24, 0 }
  0x54   : > { %p718_p13 = scmp.ge.s32.totalorder %s511_s14, 2  ;;  %s233_s5 = scalar_lea.sflag [#allocation4], %s232_s30 }
  0x56   : > { %p346_p3 = pnand %p718_p13, %p717_p7 }
  0x58   : > { %486 = dma.done.wait (!%p346_p3), %s233_s5, 32  }
  0x59   : > { %488 = vsyncadd (!%p346_p3), %s233_s5, 4294967264  ;;  %s18_s14 = sadd.s32 1, %s511_s14   ;;  %s719_s9 = smov %s495_s10 }
  0x5a   : > { %p15_p6 = scmp.ge.s32.totalorder %s18_s14, 4   ;;  %s720_s10 = smov %s499_s11 }
  0x5b   : > { %s721_s11 = smov %s586_s23  ;;  %s722_s12 = smov %s507_s13 }
  0x5c   : > { %s723_s13 = smov %s725_s17  ;;  %17 = sbr.rel (!%p15_p6) target bundleno = 6 (0x6), region = 76 }
  0x63   :  { %238 = vsyncpa [#allocation3], 1 }
  0x64   :  { %240 = vsyncpa [#allocation3 + $0x1], 1 }
  0x65   :  { %241 = vsyncpa [#allocation4], 1 }
  0x66   :  { %243 = vsyncpa [#allocation4 + $0x1], 1 }

</bundles_post_ra>
